<compile_context>
chip_gen: v6e
topology: v6e:2x2x1
jax: 0.10.0
libtpu: 0.0.40
codegen_flags: <defaults>
</compile_context>

<pallas_src>
import numpy as np
import jax
import jax.numpy as jnp
from jax import lax
from jax.experimental import pallas as pl
from jax.experimental.pallas import tpu as pltpu


# ---------------------------------------------------------------------------
# host-side helpers
# ---------------------------------------------------------------------------
def _interp_matrix(pos, size):
    """Dense [in, out] 2-tap linear-interp matrix (grid_sample padding_mode='zeros')."""
    p0 = np.floor(pos)
    frac = (pos - p0).astype(np.float32)
    p0 = p0.astype(np.int64)
    mat = np.zeros((size, size), dtype=np.float32)
    for o in range(size):
        if 0 <= p0[o] < size:
            mat[p0[o], o] += 1.0 - frac[o]
        if 0 <= p0[o] + 1 < size:
            mat[p0[o] + 1, o] += frac[o]
    return mat


# ---------------------------------------------------------------------------
# K1: separable (y, x) bilinear resampling of ZT frequency slices
# ---------------------------------------------------------------------------
def _xy_interp_kernel(re_ref, im_ref, wx_ref, wy_ref, gre_ref, gim_ref):
    # The H/W fftshift (input side) and ifftshift (output side) are baked into
    # the rolled wx/wy matrices; the T fftshift is baked into the caller's
    # input index_map.  Real+imag concatenated -> one tall batched MXU matmul
    # per interpolation axis instead of 2*ZT tiny per-slice dots.
    _, zt, h2, w2 = re_ref.shape
    ss = 2 * zt
    d = jnp.concatenate([re_ref[0], im_ref[0]], axis=0)              # (ss, h2, w2)

    # x-interp: single (ss*h2, w2) @ (w2, w2) matmul
    x = jnp.dot(d.reshape(ss * h2, w2), wx_ref[...],
                preferred_element_type=jnp.float32)
    x3 = x.reshape(ss, h2, w2)

    # y-interp: minor-dim transpose then single (ss*w2, h2) @ (h2, h2) matmul
    xt = jnp.transpose(x3, (0, 2, 1))                                # (ss, w2, h2)
    y = jnp.dot(xt.reshape(ss * w2, h2), wy_ref[...],
                preferred_element_type=jnp.float32)
    g = jnp.transpose(y.reshape(ss, w2, h2), (0, 2, 1))              # (ss, h2, w2)

    gre_ref[0] = g[:zt]
    gim_ref[0] = g[zt:]


# ---------------------------------------------------------------------------
# K2: banded 2-tap z interpolation + FK Jacobian scaling (lane-dense layout)
# ---------------------------------------------------------------------------
def _make_z_resample_kernel(M, TT, band_max, fkrange, a_iz, b_iz):
    def kernel(zlo_ref, xy2_ref, gre_hbm, gim_hbm, ore_ref, oim_ref,
               gre_s, gim_s, sem):
        b = pl.program_id(0)
        ti = pl.program_id(1)
        zlo = zlo_ref[ti]

        # Banded manual DMA: only `band_max` xy-interpolated slices per tile.
        cp_re = pltpu.make_async_copy(
            gre_hbm.at[b, pl.ds(zlo, band_max), :], gre_s, sem.at[0])
        cp_im = pltpu.make_async_copy(
            gim_hbm.at[b, pl.ds(zlo, band_max), :], gim_s, sem.at[1])
        cp_re.start()
        cp_im.start()

        hw = xy2_ref.shape[1]
        # rolled (ifftshift'd) output rows handled by this tile
        t_base = (ti * TT).astype(jnp.float32)
        t_idx = t_base + lax.broadcasted_iota(jnp.float32, (TT, 1), 0)
        # zdim at the corresponding *un-shifted* output row (ifftshift baked in)
        zd = jnp.where(t_idx < M, t_idx, t_idx - 2.0 * M) * (1.0 / M)    # (TT, 1)
        xy2 = xy2_ref[...]                                               # (1, hw)
        znew = jnp.sqrt(fkrange * xy2 + zd * zd)                         # (TT, hw)
        iz = a_iz * znew + b_iz                # un-normalised grid_sample z coord
        z0f = jnp.floor(iz)
        fz = iz - z0f
        z0 = z0f.astype(jnp.int32)
        # Jacobian: relu(zdim) == |zdim| with rows t' < z0pos zeroed.
        scale = jnp.maximum(zd, 0.0) / (znew + 1e-8)                     # (TT, hw)

        cp_re.wait()
        cp_im.wait()

        def tap(k, acc):
            acc_re, acc_im = acc
            zval = zlo + k
            # taps outside [0, 2M) never match -> grid_sample padding_mode='zeros'
            w = (jnp.where(z0 == zval, 1.0 - fz, 0.0)
                 + jnp.where(z0 + 1 == zval, fz, 0.0))
            acc_re = acc_re + w * gre_s[pl.ds(k, 1), :]
            acc_im = acc_im + w * gim_s[pl.ds(k, 1), :]
            return acc_re, acc_im

        zero = jnp.zeros((TT, hw), jnp.float32)
        acc_re, acc_im = lax.fori_loop(0, band_max, tap, (zero, zero), unroll=True)

        # single lane-dense store per output (no zero-init / RMW on the output ref)
        ore_ref[0] = acc_re * scale
        oim_ref[0] = acc_im * scale

    return kernel


# ---------------------------------------------------------------------------
# module
# ---------------------------------------------------------------------------
class LctFkFastPallas:
    """JAX/Pallas port of models/utils_pytorch/fkfast_1.10.py::lct_fk_fast."""

    def __init__(self, spatial=8, crop=16, bin_len=0.01, wall_size=2.0,
                 align_corners=False, dnum=1):
        assert 2 ** int(np.log2(crop)) == crop
        self.spatial = spatial
        self.crop = crop
        self.bin_len = bin_len
        self.wall_size = wall_size
        self.align_corners = align_corners
        self.dnum = dnum

        c = 3e8
        width = wall_size / 2.0
        bin_resolution = bin_len / c
        trange = crop * c * bin_resolution
        M, N = crop, spatial
        self.M, self.N = M, N
        two_m, two_n = 2 * M, 2 * N
        self.hw = two_n * two_n

        # gridz^2 used to pre-scale the transient measurement.
        gridz_m = np.arange(M, dtype=np.float32) / np.float32(M - 1)
        self.gridz_sq = jnp.asarray((gridz_m ** 2).astype(np.float32))     # (M,)

        # frequency-domain grids: x = xdim[w], y = xdim[h], z = zdim[t].
        zdim = ((np.arange(two_m, dtype=np.float32) - M) / M).astype(np.float32)
        xdim = ((np.arange(two_n, dtype=np.float32) - N) / N).astype(np.float32)
        fkrange = float((N * trange / (M * width * 4.0)) ** 2)
        self.fkrange = fkrange
        xy2 = (xdim[None, :] ** 2 + xdim[:, None] ** 2).astype(np.float32)  # [h, w]
        self.z0pos = int(np.where(zdim > 0)[0][0])   # == M + 1 (kept for reference)

        # grid_sample coordinate un-normalisation (PyTorch convention).
        def unnorm(coord, size):
            coord = np.asarray(coord, dtype=np.float32)
            if align_corners:
                return (coord + 1.0) * 0.5 * (size - 1)
            return ((coord + 1.0) * size - 1.0) * 0.5

        ix = unnorm(xdim, two_n)        # x-coordinate -> input W axis
        iy = unnorm(xdim, two_n)        # y-coordinate -> input H axis
        wx = _interp_matrix(ix, two_n)  # [w_in, w_out]
        wy = _interp_matrix(iy, two_n)  # [h_in, h_out]
        # Bake the input fftshift (rows) and output ifftshift (cols) along H/W
        # into the interpolation matrices: roll rows and cols by N.
        self.wx_hat = jnp.asarray(np.roll(np.roll(wx, N, axis=0), N, axis=1))
        self.wy_hat = jnp.asarray(np.roll(np.roll(wy, N, axis=0), N, axis=1))
        # x^2 + y^2 at ifftshift'd output positions, flattened lane-dense.
        xy2_rolled = np.roll(np.roll(xy2, N, axis=0), N, axis=1)
        self.xy2r_flat = jnp.asarray(xy2_rolled.reshape(1, self.hw).astype(np.float32))

        # iz = a_iz * znew + b_iz  (un-normalised grid_sample z coordinate)
        if align_corners:
            self.a_iz = (two_m - 1) * 0.5
            self.b_iz = (two_m - 1) * 0.5
        else:
            self.a_iz = float(M)
            self.b_iz = M - 0.5

        # tile sizes (ZT must divide M so the T-fftshift folds into the index_map)
        self.ZT = min(8, M)
        self.TT = min(8, two_m)
        self.nzt = two_m // self.ZT
        self.ntt = two_m // self.TT

        # Per-output-tile z band [zlo, zlo + band_max) of required input slices
        # (in the fftshift'd z coordinate used by grid_sample).  Exact bounds from
        # the min/max of x^2+y^2 over the grid, widened by 1 for f32 rounding.
        tr = np.arange(two_m, dtype=np.float32)
        zd_rolled = (np.where(tr < M, tr, tr - two_m) / np.float32(M)).astype(np.float32)
        zn_min = np.sqrt(np.float32(fkrange) * xy2.min() + zd_rolled ** 2)
        zn_max = np.sqrt(np.float32(fkrange) * xy2.max() + zd_rolled ** 2)
        lo_r = np.clip(np.floor(self.a_iz * zn_min + self.b_iz).astype(np.int64) - 1,
                       0, two_m - 1)
        hi_r = np.clip(np.floor(self.a_iz * zn_max + self.b_iz).astype(np.int64) + 2,
                       0, two_m - 1)
        lo_t = lo_r.reshape(self.ntt, self.TT).min(axis=1)
        hi_t = hi_r.reshape(self.ntt, self.TT).max(axis=1)
        self.band_max = int((hi_t - lo_t + 1).max())
        # shift each window down (if needed) so [zlo, zlo + band_max) always fits
        self.zlo = jnp.asarray(np.minimum(lo_t, two_m - self.band_max).astype(np.int32))

        self._z_kernel = _make_z_resample_kernel(
            M, self.TT, self.band_max, fkrange, self.a_iz, self.b_iz)

        # TODO(synk): the reference registers gridz/gridznew buffers with an extra
        # repeat(dnum,1,1,1,1) that makes its broadcast invalid as written; we
        # implement the intended (1, 2M, 2N, 2N, 1) broadcast, collapsed into the
        # in-kernel relu(zdim)/(znew+1e-8) Jacobian scale.

        # explicit scoped-VMEM budget (re-derive for large crop/spatial & per chip)
        self._vmem_limit = 32 * 1024 * 1024

    # -------------------------------------------------------------------
    def __call__(self, feat_bxdxtxhxw, tbes, tens):
        b, d, tnum, hnum, wnum = feat_bxdxtxhxw.shape
        assert b == 1                       # mirrors the reference module
        assert hnum == wnum == self.N
        M, N, hw = self.M, self.N, self.hw
        two_m, two_n = 2 * M, 2 * N
        for tbe, ten in zip(tbes, tens):
            assert tbe >= 0 and ten <= M and ten - tbe == tnum

        # temporal zero padding up to `crop` bins.
        padded = []
        for i in range(b):
            pre = jnp.zeros((d, tbes[i], hnum, wnum), jnp.float32)
            post = jnp.zeros((d, M - tens[i], hnum, wnum), jnp.float32)
            padded.append(jnp.concatenate(
                [pre, feat_bxdxtxhxw[i].astype(jnp.float32), post], axis=1)[None])
        featpad = jnp.concatenate(padded, axis=0)                    # (B, D, M, H, W)
        bd = b * d
        data = featpad.reshape(bd, M, hnum, wnum)

        # sqrt(relu(x * gridz^2)) -- folded into XLA (a Pallas launch costs more
        # than this math; XLA fuses it with the padding below).
        data = jnp.sqrt(jnp.maximum(data * self.gridz_sq[None, :, None, None], 0.0))

        # zero pad to (BD, 2T, 2H, 2W) and FFT.  The reference runs torch.fftn
        # over dims (-4,-3,-2,-1); the -4 axis is the flattened batch*dnum axis.
        # TODO(synk): for bd > 1 this mixes channels -- mirrored from the
        # reference as-is (identity for bd == 1).
        datapad = jnp.zeros((bd, two_m, two_n, two_n), jnp.float32)
        datapad = datapad.at[:, :M, :N, :N].set(data)
        fre = jnp.fft.fftn(datapad.astype(jnp.complex64), axes=(0, 1, 2, 3))
        fre_re = jnp.real(fre).astype(jnp.float32)
        fre_im = jnp.imag(fre).astype(jnp.float32)

        # ------------------------------------------------------------------
        # K1: separable (y, x) bilinear resampling, batched matmuls.
        # fftshift along T folded into the input index_map; along H/W into the
        # rolled interpolation matrices -> no jnp.roll of the volume.
        # ------------------------------------------------------------------
        nzt, half, zt = self.nzt, self.M // self.ZT, self.ZT
        vol_in = pl.BlockSpec((1, zt, two_n, two_n),
                              lambda bb, zi: (bb, (zi + half) % nzt, 0, 0))
        vol_out = pl.BlockSpec((1, zt, two_n, two_n),
                               lambda bb, zi: (bb, zi, 0, 0))
        mat_spec = pl.BlockSpec((two_n, two_n), lambda bb, zi: (0, 0))
        g_re, g_im = pl.pallas_call(
            _xy_interp_kernel,
            out_shape=(jax.ShapeDtypeStruct((bd, two_m, two_n, two_n), jnp.float32),
                       jax.ShapeDtypeStruct((bd, two_m, two_n, two_n), jnp.float32)),
            grid=(bd, nzt),
            in_specs=[vol_in, vol_in, mat_spec, mat_spec],
            out_specs=[vol_out, vol_out],
            compiler_params=pltpu.CompilerParams(
                dimension_semantics=("parallel", "parallel"),
                vmem_limit_bytes=self._vmem_limit),
        )(fre_re, fre_im, self.wx_hat, self.wy_hat)

        # lane-dense flat (h, w) layout for the z-resample (free reshape).
        g_re = g_re.reshape(bd, two_m, hw)
        g_im = g_im.reshape(bd, two_m, hw)

        # ------------------------------------------------------------------
        # K2: banded 2-tap z interpolation + Jacobian scale.  The ifftshift is
        # baked into the output coordinates, so the result feeds ifftn directly.
        # ------------------------------------------------------------------
        tt = self.TT
        out_spec = pl.BlockSpec((1, tt, hw), lambda bb, ti, zlo: (bb, ti, 0))
        out_re, out_im = pl.pallas_call(
            self._z_kernel,
            out_shape=(jax.ShapeDtypeStruct((bd, two_m, hw), jnp.float32),
                       jax.ShapeDtypeStruct((bd, two_m, hw), jnp.float32)),
            grid_spec=pltpu.PrefetchScalarGridSpec(
                num_scalar_prefetch=1,
                grid=(bd, self.ntt),
                in_specs=[
                    pl.BlockSpec((1, hw), lambda bb, ti, zlo: (0, 0)),
                    pl.BlockSpec(memory_space=pl.ANY),
                    pl.BlockSpec(memory_space=pl.ANY),
                ],
                out_specs=[out_spec, out_spec],
                scratch_shapes=[
                    pltpu.VMEM((self.band_max, hw), jnp.float32),
                    pltpu.VMEM((self.band_max, hw), jnp.float32),
                    pltpu.SemaphoreType.DMA((2,)),
                ]),
            compiler_params=pltpu.CompilerParams(
                dimension_semantics=("parallel", "parallel"),
                vmem_limit_bytes=self._vmem_limit),
        )(self.zlo, self.xy2r_flat, g_re, g_im)

        # inverse 3-D FFT (output already ifftshift'd), crop, squared magnitude.
        rec = jnp.fft.ifftn(
            lax.complex(out_re.reshape(bd, two_m, two_n, two_n),
                        out_im.reshape(bd, two_m, two_n, two_n)),
            axes=(1, 2, 3))
        rec = rec[:, :M, :N, :N]
        vol = (jnp.real(rec).astype(jnp.float32) ** 2
               + jnp.imag(rec).astype(jnp.float32) ** 2)
        return vol.reshape(b, d, M, N, N)


# ---------------------------------------------------------------------------
if __name__ == "__main__":
    spatial = 8
    crop = 16
    dnum = 1

    model = LctFkFastPallas(spatial=spatial, crop=crop, bin_len=0.01,
                            wall_size=2.0, align_corners=False, dnum=dnum)

    key = jax.random.PRNGKey(0)
    tbes, tens = [2], [14]
    tnum = tens[0] - tbes[0]
    feat = jax.random.normal(key, (1, dnum, tnum, spatial, spatial),
                             dtype=jnp.float32)

    out = model(feat, tbes, tens)
    out = jax.block_until_ready(out)

    assert out.shape == (1, dnum, crop, spatial, spatial)
    assert out.dtype == jnp.float32
    assert bool(jnp.all(jnp.isfinite(out)))
    print("KERNEL_OK")
</pallas_src>

<mosaic_0001>
module attributes {stable_mosaic.version = 11 : i64} {
  func.func @_xy_interp_kernel(%arg0: i32, %arg1: i32, %arg2: memref<1x8x16x16xf32, #tpu.memory_space<vmem>>, %arg3: memref<1x8x16x16xf32, #tpu.memory_space<vmem>>, %arg4: memref<16x16xf32, #tpu.memory_space<vmem>>, %arg5: memref<16x16xf32, #tpu.memory_space<vmem>>, %arg6: memref<1x8x16x16xf32, #tpu.memory_space<vmem>>, %arg7: memref<1x8x16x16xf32, #tpu.memory_space<vmem>>) attributes {dimension_semantics = [#tpu.dimension_semantics<parallel>, #tpu.dimension_semantics<parallel>], iteration_bounds = array<i64: 1, 4>, scalar_prefetch = 0 : i64, scratch_operands = 0 : i64, tpu.core_type = #tpu.core_type<tc>, window_params = [{transform_indices = @transform_0, window_bounds = array<i64: 1, 8, 16, 16>}, {transform_indices = @transform_1, window_bounds = array<i64: 1, 8, 16, 16>}, {pipeline_mode = #tpu.pipeline_mode<synchronous>, transform_indices = @transform_2, window_bounds = array<i64: 16, 16>}, {pipeline_mode = #tpu.pipeline_mode<synchronous>, transform_indices = @transform_3, window_bounds = array<i64: 16, 16>}, {transform_indices = @transform_4, window_bounds = array<i64: 1, 8, 16, 16>}, {transform_indices = @transform_5, window_bounds = array<i64: 1, 8, 16, 16>}]} {
    %c0 = arith.constant 0 : index
    %c0_0 = arith.constant 0 : index
    %c0_1 = arith.constant 0 : index
    %c0_2 = arith.constant 0 : index
    %0 = vector.load %arg2[%c0, %c0_0, %c0_1, %c0_2] : memref<1x8x16x16xf32, #tpu.memory_space<vmem>>, vector<1x8x16x16xf32>
    %1 = vector.shape_cast %0 : vector<1x8x16x16xf32> to vector<8x16x16xf32>
    %c0_3 = arith.constant 0 : index
    %c0_4 = arith.constant 0 : index
    %c0_5 = arith.constant 0 : index
    %c0_6 = arith.constant 0 : index
    %2 = vector.load %arg3[%c0_3, %c0_4, %c0_5, %c0_6] : memref<1x8x16x16xf32, #tpu.memory_space<vmem>>, vector<1x8x16x16xf32>
    %3 = vector.shape_cast %2 : vector<1x8x16x16xf32> to vector<8x16x16xf32>
    %4 = tpu.concatenate %1, %3 in 0 : vector<8x16x16xf32>, vector<8x16x16xf32> -> vector<16x16x16xf32>
    %5 = vector.shape_cast %4 : vector<16x16x16xf32> to vector<256x16xf32>
    %c0_7 = arith.constant 0 : index
    %c0_8 = arith.constant 0 : index
    %6 = vector.load %arg4[%c0_7, %c0_8] : memref<16x16xf32, #tpu.memory_space<vmem>>, vector<16x16xf32>
    %cst = arith.constant dense<0.000000e+00> : vector<256x16xf32>
    %7 = tpu.matmul %5, %6, %cst {dimension_numbers = #tpu.dot_dimension_numbers<[1], [0], [0], [1], [0, 0, 1, 1], [], []>} : vector<256x16xf32>, vector<16x16xf32>, vector<256x16xf32> -> vector<256x16xf32>
    %8 = vector.shape_cast %7 : vector<256x16xf32> to vector<16x16x16xf32>
    %9 = tpu.transpose %8, [0, 2, 1] : vector<16x16x16xf32> -> vector<16x16x16xf32>
    %10 = vector.shape_cast %9 : vector<16x16x16xf32> to vector<256x16xf32>
    %c0_9 = arith.constant 0 : index
    %c0_10 = arith.constant 0 : index
    %11 = vector.load %arg5[%c0_9, %c0_10] : memref<16x16xf32, #tpu.memory_space<vmem>>, vector<16x16xf32>
    %cst_11 = arith.constant dense<0.000000e+00> : vector<256x16xf32>
    %12 = tpu.matmul %10, %11, %cst_11 {dimension_numbers = #tpu.dot_dimension_numbers<[1], [0], [0], [1], [0, 0, 1, 1], [], []>} : vector<256x16xf32>, vector<16x16xf32>, vector<256x16xf32> -> vector<256x16xf32>
    %13 = vector.shape_cast %12 : vector<256x16xf32> to vector<16x16x16xf32>
    %14 = tpu.transpose %13, [0, 2, 1] : vector<16x16x16xf32> -> vector<16x16x16xf32>
    %15 = vector.extract_strided_slice %14 {offsets = [0, 0, 0], sizes = [8, 16, 16], strides = [1, 1, 1]} : vector<16x16x16xf32> to vector<8x16x16xf32>
    %c0_12 = arith.constant 0 : index
    %c0_13 = arith.constant 0 : index
    %c0_14 = arith.constant 0 : index
    %c0_15 = arith.constant 0 : index
    %16 = vector.load %arg6[%c0_12, %c0_13, %c0_14, %c0_15] : memref<1x8x16x16xf32, #tpu.memory_space<vmem>>, vector<1x8x16x16xf32>
    %17 = vector.shape_cast %16 : vector<1x8x16x16xf32> to vector<8x16x16xf32>
    %18 = vector.shape_cast %15 : vector<8x16x16xf32> to vector<1x8x16x16xf32>
    tpu.vector_store %arg6[%c0_12, %c0_13, %c0_14, %c0_15], %18 {strides = array<i32>} : memref<1x8x16x16xf32, #tpu.memory_space<vmem>>, vector<1x8x16x16xf32>,
    %19 = vector.extract_strided_slice %14 {offsets = [8, 0, 0], sizes = [8, 16, 16], strides = [1, 1, 1]} : vector<16x16x16xf32> to vector<8x16x16xf32>
    %c0_16 = arith.constant 0 : index
    %c0_17 = arith.constant 0 : index
    %c0_18 = arith.constant 0 : index
    %c0_19 = arith.constant 0 : index
    %20 = vector.load %arg7[%c0_16, %c0_17, %c0_18, %c0_19] : memref<1x8x16x16xf32, #tpu.memory_space<vmem>>, vector<1x8x16x16xf32>
    %21 = vector.shape_cast %20 : vector<1x8x16x16xf32> to vector<8x16x16xf32>
    %22 = vector.shape_cast %19 : vector<8x16x16xf32> to vector<1x8x16x16xf32>
    tpu.vector_store %arg7[%c0_16, %c0_17, %c0_18, %c0_19], %22 {strides = array<i32>} : memref<1x8x16x16xf32, #tpu.memory_space<vmem>>, vector<1x8x16x16xf32>,
    return
  }
  func.func @transform_0(%arg0: i32, %arg1: i32) -> (i32, i32, i32, i32) {
    %c2_i32 = arith.constant 2 : i32
    %0 = arith.addi %arg1, %c2_i32 : i32
    %c4_i32 = arith.constant 4 : i32
    %c0_i32 = arith.constant 0 : i32
    %1 = arith.cmpi eq, %c4_i32, %c0_i32 : i32
    %c1_i32 = arith.constant 1 : i32
    %2 = arith.select %1, %c1_i32, %c4_i32 : i32
    %3 = arith.remsi %0, %2 : i32
    %c0_i32_0 = arith.constant 0 : i32
    %4 = arith.cmpi ne, %3, %c0_i32_0 : i32
    %c0_i32_1 = arith.constant 0 : i32
    %5 = arith.cmpi slt, %3, %c0_i32_1 : i32
    %c0_i32_2 = arith.constant 0 : i32
    %6 = arith.cmpi slt, %2, %c0_i32_2 : i32
    %7 = arith.xori %5, %6 : i1
    %8 = arith.andi %7, %4 : i1
    %9 = arith.addi %3, %2 : i32
    %10 = arith.select %8, %9, %3 : i32
    %c0_i32_3 = arith.constant 0 : i32
    %c0_i32_4 = arith.constant 0 : i32
    %c0_i32_5 = arith.constant 0 : i32
    return %arg0, %10, %c0_i32_3, %c0_i32_4 : i32, i32, i32, i32
  }
  func.func @transform_1(%arg0: i32, %arg1: i32) -> (i32, i32, i32, i32) {
    %c2_i32 = arith.constant 2 : i32
    %0 = arith.addi %arg1, %c2_i32 : i32
    %c4_i32 = arith.constant 4 : i32
    %c0_i32 = arith.constant 0 : i32
    %1 = arith.cmpi eq, %c4_i32, %c0_i32 : i32
    %c1_i32 = arith.constant 1 : i32
    %2 = arith.select %1, %c1_i32, %c4_i32 : i32
    %3 = arith.remsi %0, %2 : i32
    %c0_i32_0 = arith.constant 0 : i32
    %4 = arith.cmpi ne, %3, %c0_i32_0 : i32
    %c0_i32_1 = arith.constant 0 : i32
    %5 = arith.cmpi slt, %3, %c0_i32_1 : i32
    %c0_i32_2 = arith.constant 0 : i32
    %6 = arith.cmpi slt, %2, %c0_i32_2 : i32
    %7 = arith.xori %5, %6 : i1
    %8 = arith.andi %7, %4 : i1
    %9 = arith.addi %3, %2 : i32
    %10 = arith.select %8, %9, %3 : i32
    %c0_i32_3 = arith.constant 0 : i32
    %c0_i32_4 = arith.constant 0 : i32
    %c0_i32_5 = arith.constant 0 : i32
    return %arg0, %10, %c0_i32_3, %c0_i32_4 : i32, i32, i32, i32
  }
  func.func @transform_2(%arg0: i32, %arg1: i32) -> (i32, i32) {
    %c0_i32 = arith.constant 0 : i32
    %c0_i32_0 = arith.constant 0 : i32
    %c0_i32_1 = arith.constant 0 : i32
    return %c0_i32, %c0_i32_0 : i32, i32
  }
  func.func @transform_3(%arg0: i32, %arg1: i32) -> (i32, i32) {
    %c0_i32 = arith.constant 0 : i32
    %c0_i32_0 = arith.constant 0 : i32
    %c0_i32_1 = arith.constant 0 : i32
    return %c0_i32, %c0_i32_0 : i32, i32
  }
  func.func @transform_4(%arg0: i32, %arg1: i32) -> (i32, i32, i32, i32) {
    %c0_i32 = arith.constant 0 : i32
    %c0_i32_0 = arith.constant 0 : i32
    %c0_i32_1 = arith.constant 0 : i32
    return %arg0, %arg1, %c0_i32, %c0_i32_0 : i32, i32, i32, i32
  }
  func.func @transform_5(%arg0: i32, %arg1: i32) -> (i32, i32, i32, i32) {
    %c0_i32 = arith.constant 0 : i32
    %c0_i32_0 = arith.constant 0 : i32
    %c0_i32_1 = arith.constant 0 : i32
    return %arg0, %arg1, %c0_i32, %c0_i32_0 : i32, i32, i32, i32
  }
}

</mosaic_0001>

<bundles_post_ra>
// kernel: tpu_custom_call.1
= control target key start
LH: loop header
LB: loop body
LE: loop exit
PB: predicated region body
PF: predicated region fallthrough
CT: control target
= control target key end

     0   :  { %s2780_s18 = smov 0   ;;  %s2782_s19 = smov 0   ;;  %s3017_s0 = inlined_call_operand.vmem [shape: f32[1,32,16,16], index: 0, kind: input, shape index: {}]   ;;  %s3018_s1 = inlined_call_operand.vmem [shape: f32[1,32,16,16], index: 1, kind: input, shape index: {}]   ;;  %s3019_s2 = inlined_call_operand.vmem [shape: f32[16,16], index: 2, kind: input, shape index: {}]   ;;  %s3020_s3 = inlined_call_operand.vmem [shape: f32[16,16], index: 3, kind: input, shape index: {}]   ;;  %s3021_s4 = inlined_call_operand.vmem [shape: f32[1,32,16,16], index: 4, kind: output, shape index: {0}]   ;;  %s3022_s5 = inlined_call_operand.vmem [shape: f32[1,32,16,16], index: 5, kind: output, shape index: {1}]  }
   0x1   :  { %s2784_s20 = smov 0  }
   0x2 LB: > { %s25_s21 = sadd.s32 1, %s2744_s19  ;;  %p2440_p0 = scmp.ge.s32.totalorder %s2748_s20, 1  ;;  %s2748_s20 = sphi %s2784_s20, %s16_s20   ;;  %s2744_s19 = sphi %s2782_s19, %s3024_s19   ;;  %s2740_s18 = sphi %s2780_s18, %s3023_s18  }
   0x3   : > { %p26_p1 = scmp.ge.s32.totalorder %s25_s21, 4  ;;  %p336_p2 = scmp.lt.s32.totalorder %s2748_s20, 5 }
   0x5   : > { %s3026_s21 = smov (%p26_p1, %s25_s21), 0  ;;  %p337_p3 = pnand %p2440_p0, %p336_p2 }
   0x6   : > { %s420_s26 = sadd.s32 (!%p337_p3), 2, %s2740_s18  ;;  %s2453_s23 = sshll.u32 (!%p337_p3), %s2740_s18, 3 }
   0x7   : > { %340 = sbr.rel (%p337_p3) target bundleno = 733 (0x2dd), region = 36  ;;  %p421_p4 = scmp.lt.s32.totalorder (!%p337_p3), %s420_s26, 0 }
   0x8   : > { %s422_s27 = ssub.s32 (!%p337_p3), 0, %s420_s26  ;;  %p497_p7 = scmp.lt.s32.totalorder (!%p337_p3), %s2453_s23, 31 }
   0x9   : > { %s2441_s28 = smin.u32 (!%p337_p3), %s422_s27, %s420_s26 }
   0xa   : > { %s424_s29 = sand.u32 (!%p337_p3), 3, %s2441_s28  }
   0xb   : > { %s425_s30 = ssub.s32 (!%p337_p3), 0, %s424_s29 }
   0xc   : > { %v549_v0 = vld [vmem:[%s3019_s2 + $0x8] sm:$0xff]  ;;  %v548_v1 = vld [vmem:[%s3019_s2] sm:$0xff]  ;;  %s3028_s30 = smov (!%p421_p4, %s425_s30), %s424_s29  ;;  %vm550_vm0 = vcmask 130048   ;;  %s3034_s23 = smov (!%p497_p7, %s2453_s23), 31 }
   0xd   : > { %2597 = vmatprep.subr.mxu0 %v549_v0  ;;  %p2443_p5 = scmp.lt.s32.totalorder %s3028_s30, 0  ;;  %s431_s6 = sadd.s32 4, %s3028_s30  ;;  %v1385_v34 = vld [vmem:[%s3020_s3 + $0x8] sm:$0xff]  ;;  %v1384_v36 = vld [vmem:[%s3020_s3] sm:$0xff] }
   0xe   : > { %2598 = vmatpush3.msra.mxu0 %v549_v0  ;;  %2649 = vmatprep.subr.mxu1 %v1385_v34  ;;  %s2527_s24 = sshll.u32 %s3034_s23, 4 }
   0xf   : > { %2599 = vmatprep.subr.mxu0 %v548_v1  ;;  %s3030_s6 = smov (!%p2443_p5, %s431_s6), %s3028_s30  ;;  %2650 = vmatpush3.msra.mxu1 %v1385_v34  ;;  %s2935_s27 = scalar_lea.vmem %s3021_s4, %s2527_s24 }
  0x10   : > { %2600 = vmatpush3.msra.mxu0 %v548_v1  ;;  %s2444_s7 = sshll.u32 %s3030_s6, 3  ;;  %2651 = vmatprep.subr.mxu1 %v1384_v36  ;;  %s2972_s29 = scalar_lea.vmem %s3022_s5, %s2527_s24 }
  0x11   : > { %p436_p6 = scmp.lt.s32.totalorder %s2444_s7, 31  ;;  %2652 = vmatpush3.msra.mxu1 %v1384_v36 }
  0x13   : > { %s3032_s7 = smov (!%p436_p6, %s2444_s7), 31 }
  0x14   : > { %s2525_s8 = sshll.u32 %s3032_s7, 4 }
  0x15   : > { %s2815_s11 = scalar_lea.vmem %s3017_s0, %s2525_s8  ;;  %s2850_s14 = scalar_lea.vmem %s3018_s1, %s2525_s8 }
  0x16   : > { %v516_v2 = vld [vmem:[%s2815_s11] sm:$0xff]  ;;  %v517_v3 = vld [vmem:[%s2815_s11 + $0x8] sm:$0xff]  ;;  %v518_v4 = vld [vmem:[%s2815_s11 + $0x10] sm:$0xff] }
  0x17   : > { %2601 = vmatprep.mubr.msk.f32.mxu0 %vm550_vm0, %v516_v2  ;;  %v519_v5 = vld [vmem:[%s2815_s11 + $0x18] sm:$0xff]  ;;  %v520_v6 = vld [vmem:[%s2815_s11 + $0x20] sm:$0xff]  ;;  %v521_v7 = vld [vmem:[%s2815_s11 + $0x28] sm:$0xff] }
  0x18   : > { %2602 = vmatmul.mubr.msk.f32.vlgmr.msra.gmra.mxu0 %vm550_vm0, %v517_v3  ;;  %v522_v8 = vld [vmem:[%s2815_s11 + $0x30] sm:$0xff]  ;;  %v523_v9 = vld [vmem:[%s2815_s11 + $0x38] sm:$0xff]  ;;  %v524_v10 = vld [vmem:[%s2815_s11 + $0x40] sm:$0xff] }
  0x19   : > { %2604 = vmatprep.mubr.msk.f32.mxu0 %vm550_vm0, %v518_v4  ;;  %v525_v11 = vld [vmem:[%s2815_s11 + $0x48] sm:$0xff]  ;;  %v526_v12 = vld [vmem:[%s2815_s11 + $0x50] sm:$0xff]  ;;  %v527_v13 = vld [vmem:[%s2815_s11 + $0x58] sm:$0xff] }
  0x1a   : > { %v528_v14 = vld [vmem:[%s2815_s11 + $0x60] sm:$0xff]  ;;  %v529_v15 = vld [vmem:[%s2815_s11 + $0x68] sm:$0xff]  ;;  %v530_v16 = vld [vmem:[%s2815_s11 + $0x70] sm:$0xff] }
  0x1b   : > { %v531_v17 = vld [vmem:[%s2815_s11 + $0x78] sm:$0xff]  ;;  %v532_v18 = vld [vmem:[%s2850_s14] sm:$0xff]  ;;  %v533_v19 = vld [vmem:[%s2850_s14 + $0x8] sm:$0xff] }
  0x1c   : > { %2605 = vmatmul.mubr.msk.f32.gmra.mxu0 %vm550_vm0, %v519_v5  ;;  %v534_v20 = vld [vmem:[%s2850_s14 + $0x10] sm:$0xff]  ;;  %v535_v21 = vld [vmem:[%s2850_s14 + $0x18] sm:$0xff]  ;;  %v536_v22 = vld [vmem:[%s2850_s14 + $0x20] sm:$0xff] }
  0x1d   : > { %2607 = vmatprep.mubr.msk.f32.mxu0 %vm550_vm0, %v520_v6  ;;  %v537_v23 = vld [vmem:[%s2850_s14 + $0x28] sm:$0xff]  ;;  %v538_v24 = vld [vmem:[%s2850_s14 + $0x30] sm:$0xff]  ;;  %v539_v25 = vld [vmem:[%s2850_s14 + $0x38] sm:$0xff] }
  0x1e   : > { %v540_v26 = vld [vmem:[%s2850_s14 + $0x40] sm:$0xff]  ;;  %v541_v27 = vld [vmem:[%s2850_s14 + $0x48] sm:$0xff]  ;;  %v542_v28 = vld [vmem:[%s2850_s14 + $0x50] sm:$0xff] }
  0x1f   : > { %v543_v29 = vld [vmem:[%s2850_s14 + $0x58] sm:$0xff]  ;;  %v544_v30 = vld [vmem:[%s2850_s14 + $0x60] sm:$0xff]  ;;  %v545_v31 = vld [vmem:[%s2850_s14 + $0x68] sm:$0xff] }
  0x20   : > { %2608 = vmatmul.mubr.msk.f32.gmra.mxu0 %vm550_vm0, %v521_v7  ;;  %v546_v32 = vld [vmem:[%s2850_s14 + $0x70] sm:$0xff]  ;;  %v547_v33 = vld [vmem:[%s2850_s14 + $0x78] sm:$0xff] }
  0x21   : > { %2610 = vmatprep.mubr.msk.f32.mxu0 %vm550_vm0, %v522_v8 }
  0x24   : > { %2611 = vmatmul.mubr.msk.f32.gmra.mxu0 %vm550_vm0, %v523_v9 }
  0x25   : > { %2613 = vmatprep.mubr.msk.f32.mxu0 %vm550_vm0, %v524_v10 }
  0x28   : > { %2614 = vmatmul.mubr.msk.f32.gmra.mxu0 %vm550_vm0, %v525_v11 }
  0x29   : > { %2616 = vmatprep.mubr.msk.f32.mxu0 %vm550_vm0, %v526_v12 }
  0x2c   : > { %2617 = vmatmul.mubr.msk.f32.gmra.mxu0 %vm550_vm0, %v527_v13 }
  0x2d   : > { %2619 = vmatprep.mubr.msk.f32.mxu0 %vm550_vm0, %v528_v14 }
  0x30   : > { %2620 = vmatmul.mubr.msk.f32.gmra.mxu0 %vm550_vm0, %v529_v15 }
  0x31   : > { %2622 = vmatprep.mubr.msk.f32.mxu0 %vm550_vm0, %v530_v16 }
  0x34   : > { %2623 = vmatmul.mubr.msk.f32.gmra.mxu0 %vm550_vm0, %v531_v17 }
  0x35   : > { %2625 = vmatprep.mubr.msk.f32.mxu0 %vm550_vm0, %v532_v18 }
  0x38   : > { %2626 = vmatmul.mubr.msk.f32.gmra.mxu0 %vm550_vm0, %v533_v19 }
  0x39   : > { %2628 = vmatprep.mubr.msk.f32.mxu0 %vm550_vm0, %v534_v20 }
  0x3c   : > { %2629 = vmatmul.mubr.msk.f32.gmra.mxu0 %vm550_vm0, %v535_v21 }
  0x3d   : > { %2631 = vmatprep.mubr.msk.f32.mxu0 %vm550_vm0, %v536_v22 }
  0x40   : > { %2632 = vmatmul.mubr.msk.f32.gmra.mxu0 %vm550_vm0, %v537_v23 }
  0x41   : > { %2634 = vmatprep.mubr.msk.f32.mxu0 %vm550_vm0, %v538_v24 }
  0x44   : > { %2635 = vmatmul.mubr.msk.f32.gmra.mxu0 %vm550_vm0, %v539_v25 }
  0x45   : > { %2637 = vmatprep.mubr.msk.f32.mxu0 %vm550_vm0, %v540_v26 }
  0x48   : > { %2638 = vmatmul.mubr.msk.f32.gmra.mxu0 %vm550_vm0, %v541_v27 }
  0x49   : > { %2640 = vmatprep.mubr.msk.f32.mxu0 %vm550_vm0, %v542_v28 }
  0x4c   : > { %2641 = vmatmul.mubr.msk.f32.gmra.mxu0 %vm550_vm0, %v543_v29 }
  0x4d   : > { %2643 = vmatprep.mubr.msk.f32.mxu0 %vm550_vm0, %v544_v30 }
  0x50   : > { %2644 = vmatmul.mubr.msk.f32.gmra.mxu0 %vm550_vm0, %v545_v31 }
  0x51   : > { %2646 = vmatprep.mubr.msk.f32.mxu0 %vm550_vm0, %v546_v32 }
  0x54   : > { %2647 = vmatmul.mubr.msk.f32.gmra.mxu0 %vm550_vm0, %v547_v33 }
  0xd8   : > { %v2603_v35 = vpop.f32.mrf.mxu0 }
  0xda   : > { %v713_v37 = vpop.f32.mrf.mxu0 }
  0xdb   : > { %872 = vxpose.xlu0.b32.start [1/2] (short) (narrow) %v713_v37, 16 }
  0xdc   : > { %v2606_v38 = vpop.f32.mrf.mxu0 }
  0xde   : > { %v723_v39 = vpop.f32.mrf.mxu0 }
  0xdf   : > { %873 = vxpose.xlu0.b32.end [2/2] (short) (narrow) %v2603_v35, 16  ;;  %904 = vxpose.xlu1.b32.start [1/2] (short) (narrow) %v723_v39, 16 }
  0xe0   : > { %v2609_v40 = vpop.f32.mrf.mxu0 }
  0xe2   : > { %v733_v41 = vpop.f32.mrf.mxu0 }
  0xe3   : > { %905 = vxpose.xlu1.b32.end [2/2] (short) (narrow) %v2606_v38, 16  ;;  %936 = vxpose.xlu0.b32.start [1/2] (short) (narrow) %v733_v41, 16 }
  0xe4   : > { %v2612_v42 = vpop.f32.mrf.mxu0 }
  0xe6   : > { %v743_v43 = vpop.f32.mrf.mxu0 }
  0xe7   : > { %937 = vxpose.xlu0.b32.end [2/2] (short) (narrow) %v2609_v40, 16  ;;  %968 = vxpose.xlu1.b32.start [1/2] (short) (narrow) %v743_v43, 16 }
  0xe8   : > { %v2615_v44 = vpop.f32.mrf.mxu0 }
  0xea   : > { %v753_v45 = vpop.f32.mrf.mxu0 }
  0xeb   : > { %969 = vxpose.xlu1.b32.end [2/2] (short) (narrow) %v2612_v42, 16  ;;  %1000 = vxpose.xlu0.b32.start [1/2] (short) (narrow) %v753_v45, 16 }
  0xec   : > { %v2618_v46 = vpop.f32.mrf.mxu0 }
  0xee   : > { %v763_v47 = vpop.f32.mrf.mxu0 }
  0xef   : > { %1001 = vxpose.xlu0.b32.end [2/2] (short) (narrow) %v2615_v44, 16  ;;  %1032 = vxpose.xlu1.b32.start [1/2] (short) (narrow) %v763_v47, 16 }
  0xf0   : > { %v2621_v48 = vpop.f32.mrf.mxu0 }
  0xf2   : > { %v773_v49 = vpop.f32.mrf.mxu0 }
  0xf3   : > { %1033 = vxpose.xlu1.b32.end [2/2] (short) (narrow) %v2618_v46, 16  ;;  %1064 = vxpose.xlu0.b32.start [1/2] (short) (narrow) %v773_v49, 16 }
  0xf4   : > { %v2624_v50 = vpop.f32.mrf.mxu0 }
  0xf6   : > { %v783_v51 = vpop.f32.mrf.mxu0 }
  0xf7   : > { %1065 = vxpose.xlu0.b32.end [2/2] (short) (narrow) %v2621_v48, 16  ;;  %1096 = vxpose.xlu1.b32.start [1/2] (short) (narrow) %v783_v51, 16 }
  0xf8   : > { %v2627_v52 = vpop.f32.mrf.mxu0 }
  0xfa   : > { %v793_v53 = vpop.f32.mrf.mxu0 }
  0xfb   : > { %1097 = vxpose.xlu1.b32.end [2/2] (short) (narrow) %v2624_v50, 16  ;;  %1128 = vxpose.xlu0.b32.start [1/2] (short) (narrow) %v793_v53, 16 }
  0xfc   : > { %v2630_v54 = vpop.f32.mrf.mxu0 }
  0xfe   : > { %v803_v55 = vpop.f32.mrf.mxu0 }
  0xff   : > { %1129 = vxpose.xlu0.b32.end [2/2] (short) (narrow) %v2627_v52, 16  ;;  %1160 = vxpose.xlu1.b32.start [1/2] (short) (narrow) %v803_v55, 16 }
 0x100   : > { %v2633_v56 = vpop.f32.mrf.mxu0 }
 0x102   : > { %v813_v57 = vpop.f32.mrf.mxu0 }
 0x103   : > { %1161 = vxpose.xlu1.b32.end [2/2] (short) (narrow) %v2630_v54, 16  ;;  %1192 = vxpose.xlu0.b32.start [1/2] (short) (narrow) %v813_v57, 16 }
 0x104   : > { %v2636_v58 = vpop.f32.mrf.mxu0 }
 0x106   : > { %v823_v59 = vpop.f32.mrf.mxu0 }
 0x107   : > { %1193 = vxpose.xlu0.b32.end [2/2] (short) (narrow) %v2633_v56, 16  ;;  %1224 = vxpose.xlu1.b32.start [1/2] (short) (narrow) %v823_v59, 16 }
 0x108   : > { %v2639_v60 = vpop.f32.mrf.mxu0 }
 0x10a   : > { %v833_v61 = vpop.f32.mrf.mxu0 }
 0x10b   : > { %1225 = vxpose.xlu1.b32.end [2/2] (short) (narrow) %v2636_v58, 16  ;;  %1256 = vxpose.xlu0.b32.start [1/2] (short) (narrow) %v833_v61, 16 }
 0x10c   : > { %v2642_v62 = vpop.f32.mrf.mxu0 }
 0x10e   : > { %v843_v63 = vpop.f32.mrf.mxu0 }
 0x10f   : > { %1257 = vxpose.xlu0.b32.end [2/2] (short) (narrow) %v2639_v60, 16  ;;  %1288 = vxpose.xlu1.b32.start [1/2] (short) (narrow) %v843_v63, 16 }
 0x110   : > { %v2645_v0 = vpop.f32.mrf.mxu0 }
 0x112   : > { %v853_v1 = vpop.f32.mrf.mxu0 }
 0x113   : > { %1289 = vxpose.xlu1.b32.end [2/2] (short) (narrow) %v2642_v62, 16  ;;  %1320 = vxpose.xlu0.b32.start [1/2] (short) (narrow) %v853_v1, 16 }
 0x114   : > { %v2648_v2 = vpop.f32.mrf.mxu0 }
 0x116   : > { %v863_v3 = vpop.f32.mrf.mxu0 }
 0x117   : > { %1321 = vxpose.xlu0.b32.end [2/2] (short) (narrow) %v2645_v0, 16  ;;  %1352 = vxpose.xlu1.b32.start [1/2] (short) (narrow) %v863_v3, 16 }
 0x11b   : > { %1353 = vxpose.xlu1.b32.end [2/2] (short) (narrow) %v2648_v2, 16 }
 0x157   : > { %v888_v4 = vpop.trf.xlu0 }
 0x158   : > { %2653 = vmatprep.mubr.msk.f32.mxu1 %vm550_vm0, %v888_v4 }
 0x15b   : > { %v889_v5 = vpop.trf.xlu0  ;;  %v920_v6 = vpop.trf.xlu1 }
 0x15c   : > { %2654 = vmatmul.mubr.msk.f32.vlgmr.msra.gmra.mxu1 %vm550_vm0, %v889_v5 }
 0x15d   : > { %2656 = vmatprep.mubr.msk.f32.mxu1 %vm550_vm0, %v920_v6 }
 0x15f   : > { %v921_v7 = vpop.trf.xlu1  ;;  %v952_v8 = vpop.trf.xlu0 }
 0x160   : > { %2657 = vmatmul.mubr.msk.f32.gmra.mxu1 %vm550_vm0, %v921_v7 }
 0x161   : > { %2659 = vmatprep.mubr.msk.f32.mxu1 %vm550_vm0, %v952_v8 }
 0x163   : > { %v953_v9 = vpop.trf.xlu0  ;;  %v984_v10 = vpop.trf.xlu1 }
 0x164   : > { %2660 = vmatmul.mubr.msk.f32.gmra.mxu1 %vm550_vm0, %v953_v9 }
 0x165   : > { %2662 = vmatprep.mubr.msk.f32.mxu1 %vm550_vm0, %v984_v10 }
 0x167   : > { %v985_v11 = vpop.trf.xlu1  ;;  %v1016_v12 = vpop.trf.xlu0 }
 0x168   : > { %2663 = vmatmul.mubr.msk.f32.gmra.mxu1 %vm550_vm0, %v985_v11 }
 0x169   : > { %2665 = vmatprep.mubr.msk.f32.mxu1 %vm550_vm0, %v1016_v12 }
 0x16b   : > { %v1017_v13 = vpop.trf.xlu0  ;;  %v1048_v14 = vpop.trf.xlu1 }
 0x16c   : > { %2666 = vmatmul.mubr.msk.f32.gmra.mxu1 %vm550_vm0, %v1017_v13 }
 0x16d   : > { %2668 = vmatprep.mubr.msk.f32.mxu1 %vm550_vm0, %v1048_v14 }
 0x16f   : > { %v1049_v15 = vpop.trf.xlu1  ;;  %v1080_v16 = vpop.trf.xlu0 }
 0x170   : > { %2669 = vmatmul.mubr.msk.f32.gmra.mxu1 %vm550_vm0, %v1049_v15 }
 0x171   : > { %2671 = vmatprep.mubr.msk.f32.mxu1 %vm550_vm0, %v1080_v16 }
 0x173   : > { %v1081_v17 = vpop.trf.xlu0  ;;  %v1112_v18 = vpop.trf.xlu1 }
 0x174   : > { %2672 = vmatmul.mubr.msk.f32.gmra.mxu1 %vm550_vm0, %v1081_v17 }
 0x175   : > { %2674 = vmatprep.mubr.msk.f32.mxu1 %vm550_vm0, %v1112_v18 }
 0x177   : > { %v1113_v19 = vpop.trf.xlu1  ;;  %v1144_v20 = vpop.trf.xlu0 }
 0x178   : > { %2675 = vmatmul.mubr.msk.f32.gmra.mxu1 %vm550_vm0, %v1113_v19 }
 0x179   : > { %2677 = vmatprep.mubr.msk.f32.mxu1 %vm550_vm0, %v1144_v20 }
 0x17b   : > { %v1145_v21 = vpop.trf.xlu0  ;;  %v1176_v22 = vpop.trf.xlu1 }
 0x17c   : > { %2678 = vmatmul.mubr.msk.f32.gmra.mxu1 %vm550_vm0, %v1145_v21 }
 0x17d   : > { %2680 = vmatprep.mubr.msk.f32.mxu1 %vm550_vm0, %v1176_v22 }
 0x17f   : > { %v1177_v23 = vpop.trf.xlu1  ;;  %v1208_v24 = vpop.trf.xlu0 }
 0x180   : > { %2681 = vmatmul.mubr.msk.f32.gmra.mxu1 %vm550_vm0, %v1177_v23 }
 0x181   : > { %2683 = vmatprep.mubr.msk.f32.mxu1 %vm550_vm0, %v1208_v24 }
 0x183   : > { %v1209_v25 = vpop.trf.xlu0  ;;  %v1240_v26 = vpop.trf.xlu1 }
 0x184   : > { %2684 = vmatmul.mubr.msk.f32.gmra.mxu1 %vm550_vm0, %v1209_v25 }
 0x185   : > { %2686 = vmatprep.mubr.msk.f32.mxu1 %vm550_vm0, %v1240_v26 }
 0x187   : > { %v1241_v27 = vpop.trf.xlu1  ;;  %v1272_v28 = vpop.trf.xlu0 }
 0x188   : > { %2687 = vmatmul.mubr.msk.f32.gmra.mxu1 %vm550_vm0, %v1241_v27 }
 0x189   : > { %2689 = vmatprep.mubr.msk.f32.mxu1 %vm550_vm0, %v1272_v28 }
 0x18b   : > { %v1273_v29 = vpop.trf.xlu0  ;;  %v1304_v30 = vpop.trf.xlu1 }
 0x18c   : > { %2690 = vmatmul.mubr.msk.f32.gmra.mxu1 %vm550_vm0, %v1273_v29 }
 0x18d   : > { %2692 = vmatprep.mubr.msk.f32.mxu1 %vm550_vm0, %v1304_v30 }
 0x18f   : > { %v1305_v31 = vpop.trf.xlu1  ;;  %v1336_v32 = vpop.trf.xlu0 }
 0x190   : > { %2693 = vmatmul.mubr.msk.f32.gmra.mxu1 %vm550_vm0, %v1305_v31 }
 0x191   : > { %2695 = vmatprep.mubr.msk.f32.mxu1 %vm550_vm0, %v1336_v32 }
 0x193   : > { %v1337_v33 = vpop.trf.xlu0  ;;  %v1368_v34 = vpop.trf.xlu1 }
 0x194   : > { %2696 = vmatmul.mubr.msk.f32.gmra.mxu1 %vm550_vm0, %v1337_v33 }
 0x195   : > { %2698 = vmatprep.mubr.msk.f32.mxu1 %vm550_vm0, %v1368_v34 }
 0x197   : > { %v1369_v35 = vpop.trf.xlu1 }
 0x198   : > { %2699 = vmatmul.mubr.msk.f32.gmra.mxu1 %vm550_vm0, %v1369_v35 }
 0x21c   : > { %v2655_v36 = vpop.f32.mrf.mxu1 }
 0x21e   : > { %v1548_v37 = vpop.f32.mrf.mxu1 }
 0x21f   : > { %1707 = vxpose.xlu0.b32.start [1/2] (short) (narrow) %v1548_v37, 16 }
 0x220   : > { %v2658_v38 = vpop.f32.mrf.mxu1 }
 0x222   : > { %v1558_v39 = vpop.f32.mrf.mxu1 }
 0x223   : > { %1708 = vxpose.xlu0.b32.end [2/2] (short) (narrow) %v2655_v36, 16  ;;  %1739 = vxpose.xlu1.b32.start [1/2] (short) (narrow) %v1558_v39, 16 }
 0x224   : > { %v2661_v40 = vpop.f32.mrf.mxu1 }
 0x226   : > { %v1568_v41 = vpop.f32.mrf.mxu1 }
 0x227   : > { %1771 = vxpose.xlu0.b32.start [1/2] (short) (narrow) %v1568_v41, 16  ;;  %1740 = vxpose.xlu1.b32.end [2/2] (short) (narrow) %v2658_v38, 16 }
 0x228   : > { %v2664_v42 = vpop.f32.mrf.mxu1 }
 0x22a   : > { %v1578_v43 = vpop.f32.mrf.mxu1 }
 0x22b   : > { %1772 = vxpose.xlu0.b32.end [2/2] (short) (narrow) %v2661_v40, 16  ;;  %1803 = vxpose.xlu1.b32.start [1/2] (short) (narrow) %v1578_v43, 16 }
 0x22c   : > { %v2667_v44 = vpop.f32.mrf.mxu1 }
 0x22e   : > { %v1588_v45 = vpop.f32.mrf.mxu1 }
 0x22f   : > { %1835 = vxpose.xlu0.b32.start [1/2] (short) (narrow) %v1588_v45, 16  ;;  %1804 = vxpose.xlu1.b32.end [2/2] (short) (narrow) %v2664_v42, 16 }
 0x230   : > { %v2670_v46 = vpop.f32.mrf.mxu1 }
 0x232   : > { %v1598_v47 = vpop.f32.mrf.mxu1 }
 0x233   : > { %1836 = vxpose.xlu0.b32.end [2/2] (short) (narrow) %v2667_v44, 16  ;;  %1867 = vxpose.xlu1.b32.start [1/2] (short) (narrow) %v1598_v47, 16 }
 0x234   : > { %v2673_v48 = vpop.f32.mrf.mxu1 }
 0x236   : > { %v1608_v49 = vpop.f32.mrf.mxu1 }
 0x237   : > { %1899 = vxpose.xlu0.b32.start [1/2] (short) (narrow) %v1608_v49, 16  ;;  %1868 = vxpose.xlu1.b32.end [2/2] (short) (narrow) %v2670_v46, 16 }
 0x238   : > { %v2676_v50 = vpop.f32.mrf.mxu1 }
 0x23a   : > { %v1618_v51 = vpop.f32.mrf.mxu1 }
 0x23b   : > { %1900 = vxpose.xlu0.b32.end [2/2] (short) (narrow) %v2673_v48, 16  ;;  %1931 = vxpose.xlu1.b32.start [1/2] (short) (narrow) %v1618_v51, 16 }
 0x23c   : > { %v2679_v52 = vpop.f32.mrf.mxu1 }
 0x23e   : > { %v1628_v53 = vpop.f32.mrf.mxu1 }
 0x23f   : > { %1963 = vxpose.xlu0.b32.start [1/2] (short) (narrow) %v1628_v53, 16  ;;  %1932 = vxpose.xlu1.b32.end [2/2] (short) (narrow) %v2676_v50, 16 }
 0x240   : > { %v2682_v54 = vpop.f32.mrf.mxu1 }
 0x242   : > { %v1638_v55 = vpop.f32.mrf.mxu1 }
 0x243   : > { %1964 = vxpose.xlu0.b32.end [2/2] (short) (narrow) %v2679_v52, 16  ;;  %1995 = vxpose.xlu1.b32.start [1/2] (short) (narrow) %v1638_v55, 16 }
 0x244   : > { %v2685_v56 = vpop.f32.mrf.mxu1 }
 0x246   : > { %v1648_v57 = vpop.f32.mrf.mxu1 }
 0x247   : > { %2027 = vxpose.xlu0.b32.start [1/2] (short) (narrow) %v1648_v57, 16  ;;  %1996 = vxpose.xlu1.b32.end [2/2] (short) (narrow) %v2682_v54, 16 }
 0x248   : > { %v2688_v58 = vpop.f32.mrf.mxu1 }
 0x24a   : > { %v1658_v59 = vpop.f32.mrf.mxu1 }
 0x24b   : > { %2028 = vxpose.xlu0.b32.end [2/2] (short) (narrow) %v2685_v56, 16  ;;  %2059 = vxpose.xlu1.b32.start [1/2] (short) (narrow) %v1658_v59, 16 }
 0x24c   : > { %v2691_v60 = vpop.f32.mrf.mxu1 }
 0x24e   : > { %v1668_v61 = vpop.f32.mrf.mxu1 }
 0x24f   : > { %2091 = vxpose.xlu0.b32.start [1/2] (short) (narrow) %v1668_v61, 16  ;;  %2060 = vxpose.xlu1.b32.end [2/2] (short) (narrow) %v2688_v58, 16 }
 0x250   : > { %v2694_v62 = vpop.f32.mrf.mxu1 }
 0x252   : > { %v1678_v63 = vpop.f32.mrf.mxu1 }
 0x253   : > { %2092 = vxpose.xlu0.b32.end [2/2] (short) (narrow) %v2691_v60, 16  ;;  %2123 = vxpose.xlu1.b32.start [1/2] (short) (narrow) %v1678_v63, 16 }
 0x254   : > { %v2697_v0 = vpop.f32.mrf.mxu1 }
 0x256   : > { %v1688_v1 = vpop.f32.mrf.mxu1 }
 0x257   : > { %2155 = vxpose.xlu0.b32.start [1/2] (short) (narrow) %v1688_v1, 16  ;;  %2124 = vxpose.xlu1.b32.end [2/2] (short) (narrow) %v2694_v62, 16 }
 0x258   : > { %v2700_v2 = vpop.f32.mrf.mxu1 }
 0x25a   : > { %v1698_v3 = vpop.f32.mrf.mxu1 }
 0x25b   : > { %2156 = vxpose.xlu0.b32.end [2/2] (short) (narrow) %v2697_v0, 16  ;;  %2187 = vxpose.xlu1.b32.start [1/2] (short) (narrow) %v1698_v3, 16 }
 0x25f   : > { %2188 = vxpose.xlu1.b32.end [2/2] (short) (narrow) %v2700_v2, 16 }
 0x29b   : > { %v1723_v4 = vpop.trf.xlu0 }
 0x29c   : > { %2219 = vst.msk [vmem:[%s2935_s27] sm:$0xff] %vm550_vm0, %v1723_v4 }
 0x29f   : > { %v1755_v5 = vpop.trf.xlu1  ;;  %v1724_v6 = vpop.trf.xlu0 }
 0x2a0   : > { %2221 = vst.msk [vmem:[%s2935_s27 + $0x10] sm:$0xff] %vm550_vm0, %v1755_v5  ;;  %2220 = vst.msk [vmem:[%s2935_s27 + $0x8] sm:$0xff] %vm550_vm0, %v1724_v6 }
 0x2a3   : > { %v1756_v7 = vpop.trf.xlu1  ;;  %v1787_v8 = vpop.trf.xlu0 }
 0x2a4   : > { %2222 = vst.msk [vmem:[%s2935_s27 + $0x18] sm:$0xff] %vm550_vm0, %v1756_v7  ;;  %2223 = vst.msk [vmem:[%s2935_s27 + $0x20] sm:$0xff] %vm550_vm0, %v1787_v8 }
 0x2a7   : > { %v1819_v9 = vpop.trf.xlu1  ;;  %v1788_v10 = vpop.trf.xlu0 }
 0x2a8   : > { %2225 = vst.msk [vmem:[%s2935_s27 + $0x30] sm:$0xff] %vm550_vm0, %v1819_v9  ;;  %2224 = vst.msk [vmem:[%s2935_s27 + $0x28] sm:$0xff] %vm550_vm0, %v1788_v10 }
 0x2ab   : > { %v1820_v11 = vpop.trf.xlu1  ;;  %v1851_v12 = vpop.trf.xlu0 }
 0x2ac   : > { %2226 = vst.msk [vmem:[%s2935_s27 + $0x38] sm:$0xff] %vm550_vm0, %v1820_v11  ;;  %2227 = vst.msk [vmem:[%s2935_s27 + $0x40] sm:$0xff] %vm550_vm0, %v1851_v12 }
 0x2af   : > { %v1883_v13 = vpop.trf.xlu1  ;;  %v1852_v14 = vpop.trf.xlu0 }
 0x2b0   : > { %2229 = vst.msk [vmem:[%s2935_s27 + $0x50] sm:$0xff] %vm550_vm0, %v1883_v13  ;;  %2228 = vst.msk [vmem:[%s2935_s27 + $0x48] sm:$0xff] %vm550_vm0, %v1852_v14 }
 0x2b3   : > { %v1884_v15 = vpop.trf.xlu1  ;;  %v1915_v16 = vpop.trf.xlu0 }
 0x2b4   : > { %2230 = vst.msk [vmem:[%s2935_s27 + $0x58] sm:$0xff] %vm550_vm0, %v1884_v15  ;;  %2231 = vst.msk [vmem:[%s2935_s27 + $0x60] sm:$0xff] %vm550_vm0, %v1915_v16 }
 0x2b7   : > { %v1947_v17 = vpop.trf.xlu1  ;;  %v1916_v18 = vpop.trf.xlu0 }
 0x2b8   : > { %2233 = vst.msk [vmem:[%s2935_s27 + $0x70] sm:$0xff] %vm550_vm0, %v1947_v17  ;;  %2232 = vst.msk [vmem:[%s2935_s27 + $0x68] sm:$0xff] %vm550_vm0, %v1916_v18 }
 0x2bb   : > { %v1948_v19 = vpop.trf.xlu1  ;;  %v1979_v20 = vpop.trf.xlu0 }
 0x2bc   : > { %2234 = vst.msk [vmem:[%s2935_s27 + $0x78] sm:$0xff] %vm550_vm0, %v1948_v19  ;;  %2235 = vst.msk [vmem:[%s2972_s29] sm:$0xff] %vm550_vm0, %v1979_v20 }
 0x2bf   : > { %v2011_v21 = vpop.trf.xlu1  ;;  %v1980_v22 = vpop.trf.xlu0 }
 0x2c0   : > { %2237 = vst.msk [vmem:[%s2972_s29 + $0x10] sm:$0xff] %vm550_vm0, %v2011_v21  ;;  %2236 = vst.msk [vmem:[%s2972_s29 + $0x8] sm:$0xff] %vm550_vm0, %v1980_v22 }
 0x2c3   : > { %v2012_v23 = vpop.trf.xlu1  ;;  %v2043_v24 = vpop.trf.xlu0 }
 0x2c4   : > { %2238 = vst.msk [vmem:[%s2972_s29 + $0x18] sm:$0xff] %vm550_vm0, %v2012_v23  ;;  %2239 = vst.msk [vmem:[%s2972_s29 + $0x20] sm:$0xff] %vm550_vm0, %v2043_v24 }
 0x2c7   : > { %v2075_v25 = vpop.trf.xlu1  ;;  %v2044_v26 = vpop.trf.xlu0 }
 0x2c8   : > { %2241 = vst.msk [vmem:[%s2972_s29 + $0x30] sm:$0xff] %vm550_vm0, %v2075_v25  ;;  %2240 = vst.msk [vmem:[%s2972_s29 + $0x28] sm:$0xff] %vm550_vm0, %v2044_v26 }
 0x2cb   : > { %v2076_v27 = vpop.trf.xlu1  ;;  %v2107_v28 = vpop.trf.xlu0 }
 0x2cc   : > { %2242 = vst.msk [vmem:[%s2972_s29 + $0x38] sm:$0xff] %vm550_vm0, %v2076_v27  ;;  %2243 = vst.msk [vmem:[%s2972_s29 + $0x40] sm:$0xff] %vm550_vm0, %v2107_v28 }
 0x2cf   : > { %v2139_v29 = vpop.trf.xlu1  ;;  %v2108_v30 = vpop.trf.xlu0 }
 0x2d0   : > { %2245 = vst.msk [vmem:[%s2972_s29 + $0x50] sm:$0xff] %vm550_vm0, %v2139_v29  ;;  %2244 = vst.msk [vmem:[%s2972_s29 + $0x48] sm:$0xff] %vm550_vm0, %v2108_v30 }
 0x2d3   : > { %v2140_v31 = vpop.trf.xlu1  ;;  %v2171_v32 = vpop.trf.xlu0 }
 0x2d4   : > { %2246 = vst.msk [vmem:[%s2972_s29 + $0x58] sm:$0xff] %vm550_vm0, %v2140_v31  ;;  %2247 = vst.msk [vmem:[%s2972_s29 + $0x60] sm:$0xff] %vm550_vm0, %v2171_v32 }
 0x2d7   : > { %v2203_v33 = vpop.trf.xlu1  ;;  %v2172_v34 = vpop.trf.xlu0 }
 0x2d8   : > { %2249 = vst.msk [vmem:[%s2972_s29 + $0x70] sm:$0xff] %vm550_vm0, %v2203_v33  ;;  %2248 = vst.msk [vmem:[%s2972_s29 + $0x68] sm:$0xff] %vm550_vm0, %v2172_v34 }
 0x2db   : > { %v2204_v35 = vpop.trf.xlu1 }
 0x2dc   : > { %2250 = vst.msk [vmem:[%s2972_s29 + $0x78] sm:$0xff] %vm550_vm0, %v2204_v35 }
 0x2dd PF: > { %s16_s20 = sadd.s32 1, %s2748_s20   ;;  %s3023_s18 = smov %s2744_s19 }
 0x2de   : > { %p13_p8 = scmp.ge.s32.totalorder %s16_s20, 6   ;;  %s3024_s19 = smov %s3026_s21 }
 0x2e0   :  { %15 = sbr.rel (!%p13_p8) target bundleno = 2 (0x2), region = 81 }

</bundles_post_ra>
